<compile_context>
chip_gen: v6e
topology: v6e:2x2x1
jax: 0.10.0
libtpu: 0.0.40
codegen_flags: <defaults>
</compile_context>

<pallas_src>
import functools

import jax
import jax.numpy as jnp
from jax import lax
from jax.experimental import pallas as pl
from jax.experimental.pallas import tpu as pltpu

LANE = 128


def _round_up(v, m):
    return ((v + m - 1) // m) * m


def _gcnn_fused_kernel(a_ref, x_ref, w1_ref, b1_ref, w2_ref, b2_ref, o_ref):
    """Fused 2-layer GCN: out = A @ relu(A @ x @ W1^T + b1) @ W2^T + b2.

    Layer 2 is reassociated as A @ (h @ W2^T) + b2. The intermediate h stays
    resident in VMEM/vregs for the whole kernel (no HBM traffic).
    """
    a = a_ref[...]        # [N, N]         f32
    x = x_ref[...]        # [N, Cin]       f32
    w1 = w1_ref[...]      # [Hpad, Cin]    f32 (zero-padded rows)
    b1 = b1_ref[...]      # [1, Hpad]      f32 (zero-padded)
    w2 = w2_ref[...]      # [Opad, Hpad]   f32 (zero-padded rows/cols)
    b2 = b2_ref[...]      # [1, Opad]      f32 (zero-padded)

    # ---- Layer 1: h = relu((A @ x) @ W1^T + b1) -------------------------
    agg = jnp.dot(a, x, preferred_element_type=jnp.float32)          # [N, Cin]
    # Contract W1 on its dim-1 directly (no in-kernel transpose / XLU work).
    h = lax.dot_general(
        agg, w1,
        dimension_numbers=(((1,), (1,)), ((), ())),
        preferred_element_type=jnp.float32,
    ) + b1                                                           # [N, Hpad]
    h = jnp.maximum(h, 0.0)

    # F.dropout(p=0.5) in eval mode == identity (inference semantics).

    # ---- Layer 2 (reassociated): out = A @ (h @ W2^T) + b2 --------------
    hw = lax.dot_general(
        h, w2,
        dimension_numbers=(((1,), (1,)), ((), ())),
        preferred_element_type=jnp.float32,
    )                                                                # [N, Opad]
    out = jnp.dot(a, hw, preferred_element_type=jnp.float32) + b2    # [N, Opad]
    o_ref[...] = out.astype(o_ref.dtype)


def _pad_axis(arr, axis, target):
    pad = target - arr.shape[axis]
    if pad <= 0:
        return arr
    widths = [(0, 0)] * arr.ndim
    widths[axis] = (0, pad)
    return jnp.pad(arr, widths)


def gcnn_fused(x, a, w1, b1, w2, b2):
    """Single fused Pallas call for the whole GCNN forward.

    x: [N, Cin], a: [N, N], w1: [H, Cin], b1: [H], w2: [O, H], b2: [O]
    Returns [N, O].
    """
    n, in_dim = x.shape
    hid_dim = w1.shape[0]
    out_dim = w2.shape[0]

    # Lane-dense padding: make the hidden / output feature dims multiples of
    # 128 so in-kernel stores and the layer-2 contraction are full-lane.
    hid_p = _round_up(hid_dim, LANE)
    out_p = _round_up(out_dim, LANE)

    w1p = _pad_axis(w1, 0, hid_p)                           # [Hpad, Cin]
    b1p = _pad_axis(b1.reshape(1, hid_dim), 1, hid_p)       # [1, Hpad]
    w2p = _pad_axis(_pad_axis(w2, 0, out_p), 1, hid_p)      # [Opad, Hpad]
    b2p = _pad_axis(b2.reshape(1, out_dim), 1, out_p)       # [1, Opad]

    flops = (2 * n * n * in_dim            # A @ x
             + 2 * n * in_dim * hid_p      # agg @ W1^T
             + 2 * n * hid_p * out_p       # h @ W2^T
             + 2 * n * n * out_p)          # A @ (h W2^T)
    bytes_accessed = 4 * (n * n + n * in_dim + hid_p * in_dim + hid_p
                          + out_p * hid_p + out_p + n * out_p)

    out_padded = pl.pallas_call(
        _gcnn_fused_kernel,
        out_shape=jax.ShapeDtypeStruct((n, out_p), jnp.float32),
        in_specs=[
            pl.BlockSpec(memory_space=pltpu.VMEM),  # A
            pl.BlockSpec(memory_space=pltpu.VMEM),  # x
            pl.BlockSpec(memory_space=pltpu.VMEM),  # W1 (padded)
            pl.BlockSpec(memory_space=pltpu.VMEM),  # b1 (padded)
            pl.BlockSpec(memory_space=pltpu.VMEM),  # W2 (padded)
            pl.BlockSpec(memory_space=pltpu.VMEM),  # b2 (padded)
        ],
        out_specs=pl.BlockSpec(memory_space=pltpu.VMEM),
        cost_estimate=pl.CostEstimate(
            flops=flops, transcendentals=0, bytes_accessed=bytes_accessed),
    )(a, x, w1p, b1p, w2p, b2p)

    # Slice the zero-padded feature columns back off outside the kernel.
    return out_padded[:, :out_dim]


def init_gcnn_params(key, in_dim, hid_dim=32, out_dim=10):
    """Deterministic nn.Linear-style (uniform +-1/sqrt(fan_in)) init."""
    k1, k2, k3, k4 = jax.random.split(key, 4)
    bound1 = 1.0 / jnp.sqrt(in_dim)
    bound2 = 1.0 / jnp.sqrt(hid_dim)
    return {
        "w1": jax.random.uniform(k1, (hid_dim, in_dim), jnp.float32, -bound1, bound1),
        "b1": jax.random.uniform(k2, (hid_dim,), jnp.float32, -bound1, bound1),
        "w2": jax.random.uniform(k3, (out_dim, hid_dim), jnp.float32, -bound2, bound2),
        "b2": jax.random.uniform(k4, (out_dim,), jnp.float32, -bound2, bound2),
    }


@jax.jit
def gcnn_forward(params, x, a):
    # h = relu(gconv1(x, A)); dropout (eval) = identity; out = gconv2(h, A)
    # -- all fused into one Pallas kernel.
    return gcnn_fused(x, a, params["w1"], params["b1"],
                      params["w2"], params["b2"])


def gcnn_reference(params, x, a):
    """Pure-JAX reference of the PyTorch forward (eval mode)."""
    h = jnp.maximum(a @ x @ params["w1"].T + params["b1"], 0.0)
    return a @ h @ params["w2"].T + params["b2"]


if __name__ == "__main__":
    key = jax.random.PRNGKey(0)
    k_x, k_a, k_p = jax.random.split(key, 3)

    N, IN_DIM, HID_DIM, OUT_DIM = 8, 16, 32, 10

    x = jax.random.normal(k_x, (N, IN_DIM), jnp.float32)
    # Simple symmetric row-normalized adjacency with self loops.
    a_rand = (jax.random.uniform(k_a, (N, N)) > 0.5).astype(jnp.float32)
    a = a_rand + a_rand.T + jnp.eye(N, dtype=jnp.float32)
    a = a / jnp.sum(a, axis=1, keepdims=True)

    params = init_gcnn_params(k_p, IN_DIM, HID_DIM, OUT_DIM)

    out = gcnn_forward(params, x, a)
    jax.block_until_ready(out)

    ref = gcnn_reference(params, x, a)
    assert out.shape == (N, OUT_DIM)
    assert jnp.allclose(out, ref, atol=1e-5, rtol=1e-5)

    print("KERNEL_OK")
</pallas_src>

<mosaic_0001>
module attributes {stable_mosaic.version = 11 : i64} {
  func.func @_gcnn_fused_kernel(%arg0: memref<8x8xf32, #tpu.memory_space<vmem>>, %arg1: memref<8x16xf32, #tpu.memory_space<vmem>>, %arg2: memref<128x16xf32, #tpu.memory_space<vmem>>, %arg3: memref<1x128xf32, #tpu.memory_space<vmem>>, %arg4: memref<128x128xf32, #tpu.memory_space<vmem>>, %arg5: memref<1x128xf32, #tpu.memory_space<vmem>>, %arg6: memref<8x128xf32, #tpu.memory_space<vmem>>) attributes {dimension_semantics = [], scalar_prefetch = 0 : i64, scratch_operands = 0 : i64, tpu.core_type = #tpu.core_type<tc>} {
    %c0 = arith.constant 0 : index
    %c0_0 = arith.constant 0 : index
    %0 = vector.load %arg0[%c0, %c0_0] : memref<8x8xf32, #tpu.memory_space<vmem>>, vector<8x8xf32>
    %c0_1 = arith.constant 0 : index
    %c0_2 = arith.constant 0 : index
    %1 = vector.load %arg1[%c0_1, %c0_2] : memref<8x16xf32, #tpu.memory_space<vmem>>, vector<8x16xf32>
    %c0_3 = arith.constant 0 : index
    %c0_4 = arith.constant 0 : index
    %2 = vector.load %arg2[%c0_3, %c0_4] : memref<128x16xf32, #tpu.memory_space<vmem>>, vector<128x16xf32>
    %c0_5 = arith.constant 0 : index
    %c0_6 = arith.constant 0 : index
    %3 = vector.load %arg3[%c0_5, %c0_6] : memref<1x128xf32, #tpu.memory_space<vmem>>, vector<1x128xf32>
    %c0_7 = arith.constant 0 : index
    %c0_8 = arith.constant 0 : index
    %4 = vector.load %arg4[%c0_7, %c0_8] : memref<128x128xf32, #tpu.memory_space<vmem>>, vector<128x128xf32>
    %c0_9 = arith.constant 0 : index
    %c0_10 = arith.constant 0 : index
    %5 = vector.load %arg5[%c0_9, %c0_10] : memref<1x128xf32, #tpu.memory_space<vmem>>, vector<1x128xf32>
    %cst = arith.constant dense<0.000000e+00> : vector<8x16xf32>
    %6 = tpu.matmul %0, %1, %cst {dimension_numbers = #tpu.dot_dimension_numbers<[1], [0], [0], [1], [0, 0, 1, 1], [], []>} : vector<8x8xf32>, vector<8x16xf32>, vector<8x16xf32> -> vector<8x16xf32>
    %cst_11 = arith.constant dense<0.000000e+00> : vector<8x128xf32>
    %7 = tpu.matmul %6, %2, %cst_11 {dimension_numbers = #tpu.dot_dimension_numbers<[1], [1], [0], [0], [0, 0, 1, 0], [], []>} : vector<8x16xf32>, vector<128x16xf32>, vector<8x128xf32> -> vector<8x128xf32>
    %8 = vector.broadcast %3 : vector<1x128xf32> to vector<8x128xf32>
    %9 = arith.addf %7, %8 : vector<8x128xf32>
    %cst_12 = arith.constant 0.000000e+00 : f32
    %10 = vector.broadcast %cst_12 : f32 to vector<8x128xf32>
    %11 = arith.maximumf %9, %10 : vector<8x128xf32>
    %cst_13 = arith.constant dense<0.000000e+00> : vector<8x128xf32>
    %12 = tpu.matmul %11, %4, %cst_13 {dimension_numbers = #tpu.dot_dimension_numbers<[1], [1], [0], [0], [0, 0, 1, 0], [], []>} : vector<8x128xf32>, vector<128x128xf32>, vector<8x128xf32> -> vector<8x128xf32>
    %cst_14 = arith.constant dense<0.000000e+00> : vector<8x128xf32>
    %13 = tpu.matmul %0, %12, %cst_14 {dimension_numbers = #tpu.dot_dimension_numbers<[1], [0], [0], [1], [0, 0, 1, 1], [], []>} : vector<8x8xf32>, vector<8x128xf32>, vector<8x128xf32> -> vector<8x128xf32>
    %14 = vector.broadcast %5 : vector<1x128xf32> to vector<8x128xf32>
    %15 = arith.addf %13, %14 : vector<8x128xf32>
    %c0_15 = arith.constant 0 : index
    %c0_16 = arith.constant 0 : index
    %16 = vector.load %arg6[%c0_15, %c0_16] : memref<8x128xf32, #tpu.memory_space<vmem>>, vector<8x128xf32>
    tpu.vector_store %arg6[%c0_15, %c0_16], %15 {strides = array<i32>} : memref<8x128xf32, #tpu.memory_space<vmem>>, vector<8x128xf32>,
    return
  }
}

</mosaic_0001>

<bundles_post_ra>
// kernel: gcnn_forward.1
= control target key start
LH: loop header
LB: loop body
LE: loop exit
PB: predicated region body
PF: predicated region fallthrough
CT: control target
= control target key end

     0   :  { %vm60_vm0 = vcmask 64512   ;;  %v588_v3 = vmov 0.0   ;;  %vm589_vm1 = vmmov 0   ;;  %vm140_vm2 = vcmask 130048   ;;  %s802_s0 = inlined_call_operand.vmem [shape: f32[8,8], index: 0, kind: input, shape index: {}]   ;;  %s803_s1 = inlined_call_operand.vmem [shape: f32[8,16], index: 1, kind: input, shape index: {}]   ;;  %s804_s2 = inlined_call_operand.vmem [shape: f32[128,16], index: 2, kind: input, shape index: {}]   ;;  %s805_s3 = inlined_call_operand.vmem [shape: f32[1,128], index: 3, kind: input, shape index: {}]   ;;  %s806_s4 = inlined_call_operand.vmem [shape: f32[128,128], index: 4, kind: input, shape index: {}]   ;;  %s807_s5 = inlined_call_operand.vmem [shape: f32[1,128], index: 5, kind: input, shape index: {}]   ;;  %s808_s6 = inlined_call_operand.hbm [shape: f32[8,128], index: 6, kind: output, shape index: {}]  }
   0x1   :  { %v25_v0 = vld [vmem:[%s803_s1] sm:$0xff]  ;;  %v41_v2 = vld [vmem:[%s804_s2 + $0x78] sm:$0xff]  ;;  %483 = vmatprep.subr.mxu0 %v588_v3  ;;  %485 = vmatprep.mubr.msk.f32.mxu0 %vm589_vm1, %v588_v3  ;;  %v40_v4 = vld [vmem:[%s804_s2 + $0x70] sm:$0xff] }
   0x2   :  { %v632_v1 = vld [vmem:[%s802_s0] sm:$0xff]  ;;  %484 = vmatpush3.msra.mxu0 %v25_v0  ;;  %488 = vmatprep.subr.mxu1 %v588_v3 }
   0x3   :  { %486 = vmatmul.mubr.msk.f32.vlgmr.msra.gmra.mxu0 %vm60_vm0, %v632_v1  ;;  %489 = vmatpush3.xpose.msk.msra.mxu1 %vm140_vm2, %v41_v2 }
   0x4   :  { %490 = vmatprep.subr.mxu1 %v588_v3  ;;  %520 = vmatprep.mubr.msk.f32.mxu1 %vm589_vm1, %v588_v3 }
   0x5   :  { %523 = vmatprep.subr.mxu0 %v588_v3  ;;  %555 = vmatprep.mubr.msk.f32.mxu0 %vm589_vm1, %v588_v3 }
   0x6   :  { %11 = vsyncpa [#allocation3], 0  ;;  %v39_v5 = vld [vmem:[%s804_s2 + $0x68] sm:$0xff]  ;;  %v38_v6 = vld [vmem:[%s804_s2 + $0x60] sm:$0xff] }
   0x7   :  { %491 = vmatpush3.xpose.msk.msra.mxu1 %vm140_vm2, %v40_v4  ;;  %v37_v7 = vld [vmem:[%s804_s2 + $0x58] sm:$0xff]  ;;  %v36_v8 = vld [vmem:[%s804_s2 + $0x50] sm:$0xff]  ;;  %v35_v9 = vld [vmem:[%s804_s2 + $0x48] sm:$0xff] }
   0x8   :  { %492 = vmatprep.subr.mxu1 %v588_v3  ;;  %v34_v10 = vld [vmem:[%s804_s2 + $0x40] sm:$0xff]  ;;  %v33_v11 = vld [vmem:[%s804_s2 + $0x38] sm:$0xff]  ;;  %v32_v12 = vld [vmem:[%s804_s2 + $0x30] sm:$0xff] }
   0x9   :  { %v31_v13 = vld [vmem:[%s804_s2 + $0x28] sm:$0xff]  ;;  %v30_v14 = vld [vmem:[%s804_s2 + $0x20] sm:$0xff]  ;;  %v29_v15 = vld [vmem:[%s804_s2 + $0x18] sm:$0xff] }
   0xa   :  { %v28_v16 = vld [vmem:[%s804_s2 + $0x10] sm:$0xff]  ;;  %v27_v17 = vld [vmem:[%s804_s2 + $0x8] sm:$0xff]  ;;  %v26_v18 = vld [vmem:[%s804_s2] sm:$0xff] }
   0xb   :  { %493 = vmatpush3.xpose.msk.msra.mxu1 %vm140_vm2, %v39_v5  ;;  %v58_v19 = vld [vmem:[%s806_s4 + $0x78] sm:$0xff]  ;;  %v57_v20 = vld [vmem:[%s806_s4 + $0x70] sm:$0xff]  ;;  %v56_v21 = vld [vmem:[%s806_s4 + $0x68] sm:$0xff] }
   0xc   :  { %494 = vmatprep.subr.mxu1 %v588_v3  ;;  %524 = vmatpush3.xpose.msra.mxu0 %v58_v19  ;;  %v55_v22 = vld [vmem:[%s806_s4 + $0x60] sm:$0xff]  ;;  %v54_v23 = vld [vmem:[%s806_s4 + $0x58] sm:$0xff]  ;;  %v53_v24 = vld [vmem:[%s806_s4 + $0x50] sm:$0xff] }
   0xd   :  { %525 = vmatprep.subr.mxu0 %v588_v3  ;;  %v52_v25 = vld [vmem:[%s806_s4 + $0x48] sm:$0xff]  ;;  %v51_v26 = vld [vmem:[%s806_s4 + $0x40] sm:$0xff]  ;;  %v50_v27 = vld [vmem:[%s806_s4 + $0x38] sm:$0xff] }
   0xe   :  { %v49_v28 = vld [vmem:[%s806_s4 + $0x30] sm:$0xff]  ;;  %v48_v29 = vld [vmem:[%s806_s4 + $0x28] sm:$0xff]  ;;  %v47_v30 = vld [vmem:[%s806_s4 + $0x20] sm:$0xff] }
   0xf   :  { %495 = vmatpush3.xpose.msk.msra.mxu1 %vm140_vm2, %v38_v6  ;;  %v46_v31 = vld [vmem:[%s806_s4 + $0x18] sm:$0xff]  ;;  %v45_v32 = vld [vmem:[%s806_s4 + $0x10] sm:$0xff]  ;;  %v44_v33 = vld [vmem:[%s806_s4 + $0x8] sm:$0xff] }
  0x10   :  { %496 = vmatprep.subr.mxu1 %v588_v3  ;;  %526 = vmatpush3.xpose.msra.mxu0 %v57_v20  ;;  %v43_v36 = vld [vmem:[%s806_s4] sm:$0xff]  ;;  %s590_s4 = smov [#allocation2]  }
  0x11   :  { %527 = vmatprep.subr.mxu0 %v588_v3  ;;  %v425_v37 = vld [vmem:[%s805_s3] ss:$0 sm:$0xff]  ;;  %s416_s13 = sshll.u32 %s590_s4, 4  ;;  %s417_s13 = int_to_ptr.vmem [resolvable:$true] %s416_s13 }
  0x12   :  { %v443_v44 = vld [vmem:[%s807_s5] ss:$0 sm:$0xff]  ;;  %s566_s3 = scalar_lea.vmem %s417_s13, 128  ;;  %p571_p1 = scmp.lt.s32.totalorder %s417_s13, %s417_s13 }
  0x13   :  { %497 = vmatpush3.xpose.msk.msra.mxu1 %vm140_vm2, %v37_v7  ;;  %p567_p0 = scmp.ne.s32.totalorder %s417_s13, %s566_s3  ;;  %p572_p2 = scmp.lt.s32.totalorder %s566_s3, %s566_s3 }
  0x14   :  { %498 = vmatprep.subr.mxu1 %v588_v3  ;;  %528 = vmatpush3.xpose.msra.mxu0 %v56_v21 }
  0x15   :  { %529 = vmatprep.subr.mxu0 %v588_v3  ;;  %p573_p3 = por %p572_p2, %p571_p1 }
  0x17   :  { %499 = vmatpush3.xpose.msk.msra.mxu1 %vm140_vm2, %v36_v8  ;;  %p574_p4 = pnand %p573_p3, %p567_p0 }
  0x18   :  { %500 = vmatprep.subr.mxu1 %v588_v3  ;;  %530 = vmatpush3.xpose.msra.mxu0 %v55_v22 }
  0x19   :  { %531 = vmatprep.subr.mxu0 %v588_v3 }
  0x1b   :  { %501 = vmatpush3.xpose.msk.msra.mxu1 %vm140_vm2, %v35_v9 }
  0x1c   :  { %502 = vmatprep.subr.mxu1 %v588_v3  ;;  %532 = vmatpush3.xpose.msra.mxu0 %v54_v23 }
  0x1d   :  { %533 = vmatprep.subr.mxu0 %v588_v3 }
  0x1f   :  { %503 = vmatpush3.xpose.msk.msra.mxu1 %vm140_vm2, %v34_v10 }
  0x20   :  { %504 = vmatprep.subr.mxu1 %v588_v3  ;;  %534 = vmatpush3.xpose.msra.mxu0 %v53_v24 }
  0x21   :  { %535 = vmatprep.subr.mxu0 %v588_v3 }
  0x23   :  { %505 = vmatpush3.xpose.msk.msra.mxu1 %vm140_vm2, %v33_v11 }
  0x24   :  { %506 = vmatprep.subr.mxu1 %v588_v3  ;;  %536 = vmatpush3.xpose.msra.mxu0 %v52_v25 }
  0x25   :  { %537 = vmatprep.subr.mxu0 %v588_v3 }
  0x27   :  { %507 = vmatpush3.xpose.msk.msra.mxu1 %vm140_vm2, %v32_v12 }
  0x28   :  { %508 = vmatprep.subr.mxu1 %v588_v3  ;;  %538 = vmatpush3.xpose.msra.mxu0 %v51_v26 }
  0x29   :  { %539 = vmatprep.subr.mxu0 %v588_v3 }
  0x2b   :  { %509 = vmatpush3.xpose.msk.msra.mxu1 %vm140_vm2, %v31_v13 }
  0x2c   :  { %510 = vmatprep.subr.mxu1 %v588_v3  ;;  %540 = vmatpush3.xpose.msra.mxu0 %v50_v27 }
  0x2d   :  { %541 = vmatprep.subr.mxu0 %v588_v3 }
  0x2f   :  { %511 = vmatpush3.xpose.msk.msra.mxu1 %vm140_vm2, %v30_v14 }
  0x30   :  { %512 = vmatprep.subr.mxu1 %v588_v3  ;;  %542 = vmatpush3.xpose.msra.mxu0 %v49_v28 }
  0x31   :  { %543 = vmatprep.subr.mxu0 %v588_v3 }
  0x33   :  { %513 = vmatpush3.xpose.msk.msra.mxu1 %vm140_vm2, %v29_v15 }
  0x34   :  { %514 = vmatprep.subr.mxu1 %v588_v3  ;;  %544 = vmatpush3.xpose.msra.mxu0 %v48_v29 }
  0x35   :  { %545 = vmatprep.subr.mxu0 %v588_v3 }
  0x37   :  { %515 = vmatpush3.xpose.msk.msra.mxu1 %vm140_vm2, %v28_v16 }
  0x38   :  { %516 = vmatprep.subr.mxu1 %v588_v3  ;;  %546 = vmatpush3.xpose.msra.mxu0 %v47_v30 }
  0x39   :  { %547 = vmatprep.subr.mxu0 %v588_v3 }
  0x3b   :  { %517 = vmatpush3.xpose.msk.msra.mxu1 %vm140_vm2, %v27_v17 }
  0x3c   :  { %518 = vmatprep.subr.mxu1 %v588_v3  ;;  %548 = vmatpush3.xpose.msra.mxu0 %v46_v31 }
  0x3d   :  { %549 = vmatprep.subr.mxu0 %v588_v3 }
  0x3f   :  { %519 = vmatpush3.xpose.msk.msra.mxu1 %vm140_vm2, %v26_v18 }
  0x40   :  { %558 = vmatprep.subr.mxu1 %v588_v3  ;;  %550 = vmatpush3.xpose.msra.mxu0 %v45_v32 }
  0x41   :  { %551 = vmatprep.subr.mxu0 %v588_v3 }
  0x44   :  { %552 = vmatpush3.xpose.msra.mxu0 %v44_v33 }
  0x45   :  { %553 = vmatprep.subr.mxu0 %v588_v3 }
  0x48   :  { %554 = vmatpush3.xpose.msra.mxu0 %v43_v36 }
  0xc3   :  { %v130_v34 = vpop.f32.mrf.mxu0 }
  0xc4   :  { %521 = vmatmul.mubr.msk.f32.vlgmr.msra.gmra.mxu1 %vm140_vm2, %v130_v34 }
  0xc5   :  { %v487_v35 = vpop.f32.mrf.mxu0  ;;  %560 = vmatprep.mubr.msk.f32.mxu1 %vm589_vm1, %v588_v3 }
 0x184   :  { %v258_v38 = vpop.f32.mrf.mxu1 }
 0x185   :  { %v259_v39 = vadd.f32 %v425_v37, %v258_v38 }
 0x186   :  { %v522_v40 = vpop.f32.mrf.mxu1 }
 0x187   :  { %v262_v41 = vmax.f32 %v259_v39, 0.0 }
 0x189   :  { %556 = vmatmul.mubr.f32.vlgmr.msra.gmra.mxu0 %v262_v41 }
 0x249   :  { %v329_v42 = vpop.f32.mrf.mxu0 }
 0x24a   :  { %559 = vmatpush3.msra.mxu1 %v329_v42 }
 0x24b   :  { %v557_v43 = vpop.f32.mrf.mxu0  ;;  %561 = vmatmul.mubr.msk.f32.vlgmr.msra.gmra.mxu1 %vm60_vm0, %v632_v1 }
 0x30b   :  { %v405_v45 = vpop.f32.mrf.mxu1 }
 0x30c   :  { %v406_v46 = vadd.f32 %v443_v44, %v405_v45 }
 0x30d   :  { %v562_v47 = vpop.f32.mrf.mxu1 }
 0x30e   :  { %409 = vst [vmem:[#allocation2] sm:$0xff] %v406_v46 }
 0x30f   :  { %577 = shalt.err (!%p574_p4)
}
 0x310   :  { %419 = dma.vmem_to_hbm [thread:$0]  %s417_s13, 128, %s808_s6, [#allocation3]  }
 0x311   :  { %586 = dma.done.wait [#allocation3], 128  }
 0x312   :  { %587 = vsyncadd [#allocation3], 4294967168 }
 0x313   :  { %423 = vsyncpa [#allocation3], 1 }

</bundles_post_ra>
